<compile_context>
chip_gen: v7x
topology: tpu7x:2x2x1
jax: 0.10.0
libtpu: 0.0.40
codegen_flags: <defaults>
</compile_context>

<pallas_src>
import functools

import jax
import jax.numpy as jnp
import numpy as np
from jax.experimental import pallas as pl
from jax.experimental.pallas import tpu as pltpu


def _relxy_kernel(p_ref, t_ref, out_ref, *, n_rows, chan_len, tm, lt):
    """Per-block partial sum of (k_xx^2 + k_xy^2 + k_yy^2).

    p_ref, t_ref : (tm, lt) blocks of the flattened (N, C*H*W) pred / true.
    out_ref      : (1, 1) SMEM block holding this grid step's partial sum.
    """
    i = pl.program_id(0)
    j = pl.program_id(1)

    p = p_ref[...].astype(jnp.float32)
    t = t_ref[...].astype(jnp.float32)

    # Global row / flattened-column indices covered by this block.
    row = jax.lax.broadcasted_iota(jnp.int32, (tm, lt), 0) + i * tm
    col = jax.lax.broadcasted_iota(jnp.int32, (tm, lt), 1) + j * lt

    # Only rows < N and columns belonging to channels 0..2 contribute.
    valid = (row < n_rows) & (col < 3 * chan_len)
    # Channel 1 (columns [L, 2L)) is the *relative* term: divide by y_true.
    ch1 = (col >= chan_len) & (col < 2 * chan_len)

    denom = jnp.where(ch1 & valid, t, jnp.float32(1.0))
    k = (p - t) / denom
    sq = jnp.where(valid, k * k, jnp.float32(0.0))   # select kills masked inf/nan

    out_ref[0, 0] = jnp.sum(sq)


def _choose_tiles(n, w):
    """Pick (tm, lt): last-two-dims legal blocks, ~1 MiB f32 VMEM per input block."""
    if w < 128:
        lt = w                               # full (ragged) width block
    else:
        lt = min(2048, (w // 128) * 128)     # lane-aligned, <= w
    target_bytes = 1 << 20                   # ~1 MiB per input block
    rows = max(8, (target_bytes // (lt * 4)) // 8 * 8)
    if n <= 8:
        tm = n                               # full (ragged) row dim
    else:
        tm = min((n // 8) * 8, rows)         # multiple of 8
    return tm, lt


@jax.jit
def relxy_mse_loss(y_pred, y_true):
    """Pallas implementation of RelXYMSELoss.forward (returns the scalar loss)."""
    if y_true.ndim == 1:
        y_pred = y_pred[None]
        y_true = y_true[None]

    n, c = y_true.shape[0], y_true.shape[1]
    # Free contiguous reshape: (N, C, ...) -> (N, C * prod(spatial)).
    p = y_pred.reshape(n, -1)
    t = y_true.reshape(n, -1)
    w = t.shape[1]
    l = w // c                               # flattened spatial size per channel

    tm, lt = _choose_tiles(n, w)
    grid = (pl.cdiv(n, tm), pl.cdiv(w, lt))

    kernel = functools.partial(_relxy_kernel, n_rows=n, chan_len=l, tm=tm, lt=lt)

    partials = pl.pallas_call(
        kernel,
        out_shape=jax.ShapeDtypeStruct(grid, jnp.float32),
        grid_spec=pltpu.PrefetchScalarGridSpec(
            num_scalar_prefetch=0,
            grid=grid,
            in_specs=[
                pl.BlockSpec((tm, lt), lambda i, j: (i, j)),
                pl.BlockSpec((tm, lt), lambda i, j: (i, j)),
            ],
            out_specs=pl.BlockSpec(
                (1, 1), lambda i, j: (i, j), memory_space=pltpu.SMEM
            ),
        ),
        compiler_params=pltpu.CompilerParams(
            dimension_semantics=("parallel", "parallel"),
            vmem_limit_bytes=32 * 1024 * 1024,
        ),
    )(p, t)

    return (jnp.sum(partials) / jnp.float32(n * l)).astype(jnp.float32)


def _reference(y_pred, y_true):
    if y_true.ndim == 1:
        y_pred = y_pred[None]
        y_true = y_true[None]
    k_xx = y_pred[:, 0, ...] - y_true[:, 0, ...]
    k_xy = (y_pred[:, 1, ...] - y_true[:, 1, ...]) / y_true[:, 1, ...]
    k_yy = y_pred[:, 2, ...] - y_true[:, 2, ...]
    return jnp.mean(k_xx**2 + k_xy**2 + k_yy**2)


if __name__ == "__main__":
    # Deterministic "weights" init (unused in forward, as in the PyTorch module).
    weights = jnp.ones((3,), dtype=jnp.float32)

    key = jax.random.PRNGKey(0)
    k1, k2, k3, k4 = jax.random.split(key, 4)

    # Primary check: NCHW batch=2, channels=4 (only first 3 used), spatial 16x16.
    y_pred = jax.random.normal(k1, (2, 4, 16, 16), dtype=jnp.float32)
    y_true = jax.random.normal(k2, (2, 4, 16, 16), dtype=jnp.float32) + 2.0
    out = jax.block_until_ready(relxy_mse_loss(y_pred, y_true))
    ref = jax.block_until_ready(_reference(y_pred, y_true))
    assert np.allclose(np.asarray(out), np.asarray(ref), rtol=1e-5, atol=1e-5), (out, ref)

    # Secondary check: ragged shapes (exercise the in-kernel row/lane masking).
    y_pred2 = jax.random.normal(k3, (5, 3, 7, 9), dtype=jnp.float32)
    y_true2 = jax.random.normal(k4, (5, 3, 7, 9), dtype=jnp.float32) + 2.0
    out2 = jax.block_until_ready(relxy_mse_loss(y_pred2, y_true2))
    ref2 = jax.block_until_ready(_reference(y_pred2, y_true2))
    assert np.allclose(np.asarray(out2), np.asarray(ref2), rtol=1e-5, atol=1e-5), (out2, ref2)

    print("KERNEL_OK")
</pallas_src>

<mosaic_0001>
module attributes {stable_mosaic.version = 11 : i64} {
  func.func @_relxy_kernel(%arg0: i32, %arg1: i32, %arg2: memref<2x1024xf32, #tpu.memory_space<vmem>>, %arg3: memref<2x1024xf32, #tpu.memory_space<vmem>>, %arg4: memref<1x1xf32, #tpu.memory_space<smem>>) attributes {dimension_semantics = [#tpu.dimension_semantics<parallel>, #tpu.dimension_semantics<parallel>], iteration_bounds = array<i64: 1, 1>, scalar_prefetch = 0 : i64, scratch_operands = 0 : i64, tpu.core_type = #tpu.core_type<tc>, window_params = [{transform_indices = @transform_0, window_bounds = array<i64: 2, 1024>}, {transform_indices = @transform_1, window_bounds = array<i64: 2, 1024>}, {transform_indices = @transform_2, window_bounds = array<i64: 1, 1>}]} {
    %c0 = arith.constant 0 : index
    %c0_0 = arith.constant 0 : index
    %0 = vector.load %arg2[%c0, %c0_0] : memref<2x1024xf32, #tpu.memory_space<vmem>>, vector<2x1024xf32>
    %c0_1 = arith.constant 0 : index
    %c0_2 = arith.constant 0 : index
    %1 = vector.load %arg3[%c0_1, %c0_2] : memref<2x1024xf32, #tpu.memory_space<vmem>>, vector<2x1024xf32>
    %2 = tpu.iota {dimensions = array<i32: 0>} : vector<2x1024xi32>
    %c2_i32 = arith.constant 2 : i32
    %3 = arith.muli %arg0, %c2_i32 : i32
    %4 = vector.broadcast %3 : i32 to vector<2x1024xi32>
    %5 = arith.addi %2, %4 : vector<2x1024xi32>
    %6 = tpu.iota {dimensions = array<i32: 1>} : vector<2x1024xi32>
    %c1024_i32 = arith.constant 1024 : i32
    %7 = arith.muli %arg1, %c1024_i32 : i32
    %8 = vector.broadcast %7 : i32 to vector<2x1024xi32>
    %9 = arith.addi %6, %8 : vector<2x1024xi32>
    %c2_i32_3 = arith.constant 2 : i32
    %10 = vector.broadcast %c2_i32_3 : i32 to vector<2x1024xi32>
    %11 = arith.cmpi slt, %5, %10 : vector<2x1024xi32>
    %c768_i32 = arith.constant 768 : i32
    %12 = vector.broadcast %c768_i32 : i32 to vector<2x1024xi32>
    %13 = arith.cmpi slt, %9, %12 : vector<2x1024xi32>
    %14 = arith.andi %11, %13 : vector<2x1024xi1>
    %c256_i32 = arith.constant 256 : i32
    %15 = vector.broadcast %c256_i32 : i32 to vector<2x1024xi32>
    %16 = arith.cmpi sge, %9, %15 : vector<2x1024xi32>
    %c512_i32 = arith.constant 512 : i32
    %17 = vector.broadcast %c512_i32 : i32 to vector<2x1024xi32>
    %18 = arith.cmpi slt, %9, %17 : vector<2x1024xi32>
    %19 = arith.andi %16, %18 : vector<2x1024xi1>
    %20 = arith.andi %19, %14 : vector<2x1024xi1>
    %cst = arith.constant 1.000000e+00 : f32
    %21 = vector.broadcast %cst : f32 to vector<2x1024xf32>
    %22 = arith.select %20, %1, %21 : vector<2x1024xi1>, vector<2x1024xf32>
    %23 = arith.subf %0, %1 : vector<2x1024xf32>
    %24 = arith.divf %23, %22 : vector<2x1024xf32>
    %25 = arith.mulf %24, %24 : vector<2x1024xf32>
    %cst_4 = arith.constant 0.000000e+00 : f32
    %26 = vector.broadcast %cst_4 : f32 to vector<2x1024xf32>
    %27 = arith.select %14, %25, %26 : vector<2x1024xi1>, vector<2x1024xf32>
    %28 = vector.shape_cast %27 : vector<2x1024xf32> to vector<1x2x1024xf32>
    %cst_5 = arith.constant dense<0.000000e+00> : vector<1xf32>
    %29 = vector.multi_reduction <add>, %28, %cst_5 [1, 2] : vector<1x2x1024xf32> to vector<1xf32>
    %30 = vector.shape_cast %29 : vector<1xf32> to vector<1x1x1xf32>
    %31 = vector.extract %30[0, 0, 0] : f32 from vector<1x1x1xf32>
    %c0_6 = arith.constant 0 : index
    %c0_7 = arith.constant 0 : index
    %32 = memref.load %arg4[%c0_6, %c0_7] : memref<1x1xf32, #tpu.memory_space<smem>>
    memref.store %31, %arg4[%c0_6, %c0_7] : memref<1x1xf32, #tpu.memory_space<smem>>
    return
  }
  func.func @transform_0(%arg0: i32, %arg1: i32) -> (i32, i32) {
    %c0_i32 = arith.constant 0 : i32
    return %arg0, %arg1 : i32, i32
  }
  func.func @transform_1(%arg0: i32, %arg1: i32) -> (i32, i32) {
    %c0_i32 = arith.constant 0 : i32
    return %arg0, %arg1 : i32, i32
  }
  func.func @transform_2(%arg0: i32, %arg1: i32) -> (i32, i32) {
    %c0_i32 = arith.constant 0 : i32
    return %arg0, %arg1 : i32, i32
  }
}

</mosaic_0001>

<bundles_post_ra>
// kernel: relxy_mse_loss.1
= control target key start
LH: loop header
LB: loop body
LE: loop exit
PB: predicated region body
PF: predicated region fallthrough
CT: control target
= control target key end

     0   :  { %v16_v1 = vlaneseq  ;;  %v307_v2 = vmov 1983009808   ;;  %s363_s0 = inlined_call_operand.vmem [shape: f32[2,1024], index: 0, kind: input, shape index: {}]   ;;  %s364_s1 = inlined_call_operand.vmem [shape: f32[2,1024], index: 1, kind: input, shape index: {}]   ;;  %s365_s2 = inlined_call_operand.hbm [shape: f32[1,1], index: 2, kind: output, shape index: {}]  }
   0x1   :  { %v14_v0 = vld [vmem:[%s364_s1] sm:$0xff]  ;;  %v100_v3 = vunpack.c.l.s4 %v307_v2 }
   0x2   :  { %7 = vsyncpa [#allocation3], 0  ;;  %v17_v4 = vshrl.u32 %v16_v1, 7  ;;  %v91_v5 = vcombine.high %v14_v0, %v14_v0  ;;  %v308_v7 = vmov 1.0   ;;  %v13_v19 = vld [vmem:[%s363_s0 + $0x8] sm:$0xff]  ;;  %v12_v23 = vld [vmem:[%s363_s0] sm:$0xff] }
   0x3   :  { %v101_v6 = vunpack.c.0.s8 %v100_v3  ;;  %v151_v8 = vcombine.low %v308_v7, %v308_v7  ;;  %v15_v20 = vld [vmem:[%s364_s1 + $0x8] sm:$0xff]  ;;  %v141_v24 = vsub.f32 %v12_v23, %v14_v0  ;;  %vm245_vm1 = vcmask 1041408   ;;  %s295_s18 = scalar_lea.hbm %s365_s2, 16 }
   0x4   :  { %vm40_vm0 = vcmp.lt.s32.totalorder %v17_v4, 2  ;;  %v142_v21 = vsub.f32 %v13_v19, %v15_v20  ;;  %p296_p0 = scmp.ne.s32.totalorder %s365_s2, %s295_s18  ;;  %p299_p1 = scmp.lt.u32.totalorder %s295_s18, %s365_s2 }
   0x5   :  { %v104_v9 = vsub.s32 %v101_v6, %v17_v4 }
   0x6   :  { %p301_p2 = pnand %p299_p1, %p296_p0 }
   0x7   :  { %v105_v10 = vrot.slane %v91_v5, %v104_v9  ;;  %v159_v11 = vrot.slane %v151_v8, %v104_v9 }
   0x9   :  { %v107_v12 = vcombine.high %v105_v10, %v105_v10  ;;  %v135_v13 = vsel %vm40_vm0, %v105_v10, 1.0  ;;  %v184_v14 = vcombine.low %v159_v11, %v159_v11 }
   0xb   :  { %v136_v15 = vsel %vm40_vm0, %v107_v12, 1.0  ;;  %291 = vrcp.f32 %v184_v14 }
   0xc   :  { %v152_v16 = vcombine.low %v135_v13, %v136_v15 }
   0xe   :  { %v166_v17 = vrot.slane %v152_v16, %v104_v9 }
  0x10   :  { %v167_v18 = vcombine.low %v159_v11, %v166_v17 }
  0x12   :  { %293 = vrcp.f32 %v167_v18 }
  0x15   :  { %v292_v22 = vpop.eup %291 }
  0x16   :  { %v190_v25 = vmul.f32 %v292_v22, %v142_v21 }
  0x18   :  { %v192_v28 = vmul.f32 %v190_v25, %v190_v25 }
  0x1a   :  { %v219_v32 = vrot.slane %v192_v28, %v104_v9 }
  0x1c   :  { %v294_v26 = vpop.eup %293  ;;  %v227_v38 = vcombine.high %v219_v32, %v219_v32  ;;  %v241_v44 = vsel %vm40_vm0, %v219_v32, 0.0 }
  0x1d   :  { %v188_v27 = vmul.f32 %v294_v26, %v141_v24  ;;  %v253_v49 = vsel %vm245_vm1, %v241_v44, 0.0 }
  0x1e   :  { %v242_v47 = vsel %vm40_vm0, %v227_v38, 0.0 }
  0x1f   :  { %v191_v29 = vmul.f32 %v188_v27, %v188_v27  ;;  %v255_v51 = vsel %vm245_vm1, %v242_v47, 0.0 }
  0x21   :  { %v195_v30 = vcombine.high %v191_v29, %v191_v29  ;;  %v202_v31 = vrot.slane %v191_v29, %v104_v9 }
  0x23   :  { %v209_v33 = vrot.slane %v195_v30, %v104_v9  ;;  %v210_v34 = vcombine.high %v202_v31, %v202_v31  ;;  %v237_v35 = vsel %vm40_vm0, %v202_v31, 0.0 }
  0x24   :  { %v246_v36 = vsel %vm245_vm1, %v237_v35, 0.0 }
  0x25   :  { %v211_v37 = vcombine.high %v209_v33, %v209_v33  ;;  %v238_v39 = vsel %vm40_vm0, %v210_v34, 0.0  ;;  %v239_v40 = vsel %vm40_vm0, %v209_v33, 0.0 }
  0x26   :  { %v247_v41 = vsel %vm245_vm1, %v238_v39, 0.0  ;;  %v249_v42 = vsel %vm245_vm1, %v239_v40, 0.0 }
  0x27   :  { %v240_v43 = vsel %vm40_vm0, %v211_v37, 0.0  ;;  %v248_v45 = vadd.f32 %v247_v41, %v246_v36 }
  0x28   :  { %v251_v46 = vsel %vm245_vm1, %v240_v43, 0.0 }
  0x29   :  { %v250_v48 = vadd.f32 %v249_v42, %v248_v45 }
  0x2b   :  { %v252_v50 = vadd.f32 %v251_v46, %v250_v48 }
  0x2d   :  { %v254_v52 = vadd.f32 %v253_v49, %v252_v50 }
  0x2f   :  { %v256_v53 = vadd.f32 %v255_v51, %v254_v52 }
  0x31   :  { %261 = vadd.xlane.f32.xlu0 %v256_v53 }
  0xbe   :  { %v262_v54 = vpop.xlane.xlu0 %261 }
  0xbf   :  { %v263_v55 = vrot.slane %v262_v54, 4 }
  0xc1   :  { %v264_v56 = vadd.f32 %v263_v55, %v262_v54 }
  0xc3   :  { %v265_v57 = vrot.slane %v264_v56, 2 }
  0xc5   :  { %v266_v58 = vadd.f32 %v265_v57, %v264_v56 }
  0xc7   :  { %v267_v59 = vrot.slane %v266_v58, 1 }
  0xc9   :  { %v268_v60 = vadd.f32 %v267_v59, %v266_v58 }
  0xcb   :  { %285 = vpush %v268_v60 }
  0xfc   :  { %s286_s0 = spop %285 }
  0xfd   :  { %271 = sst [smem:[#allocation2]] %s286_s0 }
  0xfe   :  { %304 = shalt.err (!%p301_p2)
}
  0xff   :  { %s309_s23 = smov [#allocation2]  }
 0x100   :  { %279 = dma.smem_to_hbm %s309_s23, 16, %s365_s2, [#allocation3]  }
 0x101   :  { %305 = dma.done.wait [#allocation3], 16  }
 0x102   :  { %306 = vsyncadd [#allocation3], 4294967280 }
 0x103   :  { %283 = sfence }
 0x104   :  { %284 = vsyncpa [#allocation3], 1 }

</bundles_post_ra>
